<compile_context>
chip_gen: v7x
topology: tpu7x:2x2x1
jax: 0.10.0
libtpu: 0.0.40
codegen_flags: <defaults>
</compile_context>

<pallas_src>
import functools

import jax
import jax.numpy as jnp
from jax.experimental import pallas as pl
from jax.experimental.pallas import tpu as pltpu


def _round_up(x, m):
    return (x + m - 1) // m * m


def _ant_mlce_kernel(logits_ref, target_ref, partial_ref, *, batch_size, tile_b,
                     mask_rows):
    # logits_ref : (tile_b, A, K)  -- the t = T-1 slab, selected by the BlockSpec
    # target_ref : (tile_b, A, K)
    # partial_ref: (1, A, K)       -- per-tile partial sums (reduced over tile_b only)
    logits = logits_ref[...].astype(jnp.float32)
    target = target_ref[...].astype(jnp.float32)

    # log_softmax over the class (lane) axis, numerically stabilized.
    m = jnp.max(logits, axis=-1, keepdims=True)
    shifted = logits - m
    lse = jnp.log(jnp.sum(jnp.exp(shifted), axis=-1, keepdims=True))
    log_sm = shifted - lse

    # F.normalize(target): L2 over classes, denominator = max(||t||, 1e-12).
    norm = jnp.sqrt(jnp.sum(target * target, axis=-1, keepdims=True))
    t_norm = target * pl.reciprocal(jnp.maximum(norm, 1e-12))

    prod = -t_norm * log_sm                                     # (tile_b, A, K)

    if mask_rows:
        # Ragged last batch tile: rows past B hold unspecified data -> select 0 there
        # (jnp.where is a select, so NaN garbage cannot propagate).
        b0 = pl.program_id(0) * tile_b
        row = jax.lax.broadcasted_iota(jnp.int32, prod.shape, 0)
        prod = jnp.where(b0 + row < batch_size, prod, 0.0)

    # Only collapse the (cheap, VPU) batch-tile axis here; the final reduction runs
    # once in the wrapper over a tiny (num_tiles, A, K) array.
    partial_ref[...] = jnp.sum(prod, axis=0, keepdims=True)


def oad_ant_mlce_loss(anticipation_logits, ant_target, *, reduction="sum",
                      target_block_bytes=1 << 20):
    """Anticipation multi-label cross-entropy loss.

    anticipation_logits: (B, T, A, K); ant_target: (B, A, K).
    Equivalent to the PyTorch module's mlce_loss applied to
    anticipation_logits[:, -1].reshape(-1, K) vs ant_target.reshape(-1, K).
    """
    B, T, A, K = anticipation_logits.shape
    assert ant_target.shape == (B, A, K), ant_target.shape

    # --- byte-sized batch tiling -------------------------------------------------
    # An (A, K) slab occupies round_up(A, 8) x round_up(K, 128) elements in VMEM;
    # budget with 4 bytes (f32 compute dtype) so the same tile is safe for bf16 or f32.
    padded_slab_bytes = _round_up(A, 8) * _round_up(K, 128) * 4
    tile_b = max(1, target_block_bytes // padded_slab_bytes)
    tile_b = min(tile_b, B)
    num_tiles = pl.cdiv(B, tile_b)
    t_last = T - 1

    kernel = functools.partial(
        _ant_mlce_kernel,
        batch_size=B,
        tile_b=tile_b,
        mask_rows=(B % tile_b != 0),
    )

    partials = pl.pallas_call(
        kernel,
        out_shape=jax.ShapeDtypeStruct((num_tiles, A, K), jnp.float32),
        grid_spec=pltpu.PrefetchScalarGridSpec(
            num_scalar_prefetch=0,
            grid=(num_tiles,),
            in_specs=[
                # Fused time-step slice: block covers (tile_b, 1, A, K) at t = T-1,
                # the T dim is squeezed away inside the kernel.
                pl.BlockSpec((tile_b, pl.Squeezed(), A, K),
                             lambda i: (i, t_last, 0, 0)),
                pl.BlockSpec((tile_b, A, K), lambda i: (i, 0, 0)),
            ],
            out_specs=pl.BlockSpec((1, A, K), lambda i: (i, 0, 0)),
        ),
        compiler_params=pltpu.CompilerParams(
            # Independent per-tile partial outputs -> the single grid axis can be
            # sharded across TensorCores (megacore / v7x's 2 TCs).
            dimension_semantics=("parallel",),
            vmem_limit_bytes=32 * 1024 * 1024,
        ),
    )(anticipation_logits, ant_target)

    loss = jnp.sum(partials)
    if reduction == "mean":
        loss = loss / (B * A)
    return loss


def oad_ant_loss_forward(out_dict, target, ant_target, *, num_classes,
                         reduction="sum"):
    """Equivalent of OadAntLoss.forward (anticipation_loss path, reduction='sum')."""
    del target  # unused by the anticipation loss; kept for signature parity
    anticipation_logits = out_dict["anticipation_logits"]      # (B, T, A, K)
    assert anticipation_logits.shape[-1] == num_classes
    return oad_ant_mlce_loss(anticipation_logits, ant_target, reduction=reduction)


def _reference_loss(anticipation_logits, ant_target, num_classes, reduction="sum"):
    logits = anticipation_logits[:, -1, :, :].reshape(-1, num_classes).astype(jnp.float32)
    tgt = ant_target.reshape(-1, num_classes).astype(jnp.float32)
    log_sm = jax.nn.log_softmax(logits, axis=-1)
    norm = jnp.sqrt(jnp.sum(tgt * tgt, axis=-1, keepdims=True))
    t_norm = tgt / jnp.maximum(norm, 1e-12)
    per_row = jnp.sum(-t_norm * log_sm, axis=-1)
    return jnp.sum(per_row) if reduction == "sum" else jnp.mean(per_row)


if __name__ == "__main__":
    # Small synthetic shapes: batch=2, seq=8, anticipation steps=4, num_classes=32
    B, T, A, K = 2, 8, 4, 32
    key = jax.random.PRNGKey(0)
    k1, k2, k3 = jax.random.split(key, 3)

    anticipation_logits = jax.random.normal(k1, (B, T, A, K), dtype=jnp.float32)
    # multi-label soft targets (non-negative), like the PyTorch module expects
    ant_target = jax.nn.relu(jax.random.normal(k2, (B, A, K), dtype=jnp.float32))
    target = jax.random.normal(k3, (B, T, K), dtype=jnp.float32)  # unused by anticipation_loss

    out_dict = {"anticipation_logits": anticipation_logits}

    loss = oad_ant_loss_forward(out_dict, target, ant_target, num_classes=K)
    loss = jax.block_until_ready(loss)

    ref = _reference_loss(anticipation_logits, ant_target, K)
    assert jnp.allclose(loss, ref, rtol=1e-5, atol=1e-5), (loss, ref)

    # Second check: ragged batch tiling (B not divisible by tile_b) exercises the
    # in-kernel row mask.
    B2 = 5
    k4, k5 = jax.random.split(k3)
    logits2 = jax.random.normal(k4, (B2, T, A, K), dtype=jnp.float32)
    target2 = jax.nn.relu(jax.random.normal(k5, (B2, A, K), dtype=jnp.float32))
    loss2 = oad_ant_mlce_loss(logits2, target2, target_block_bytes=2 * 4096)  # tile_b=2
    loss2 = jax.block_until_ready(loss2)
    ref2 = _reference_loss(logits2, target2, K)
    assert jnp.allclose(loss2, ref2, rtol=1e-5, atol=1e-5), (loss2, ref2)

    print("KERNEL_OK")
</pallas_src>

<mosaic_0001>
module attributes {stable_mosaic.version = 11 : i64} {
  func.func @_ant_mlce_kernel(%arg0: i32, %arg1: memref<2x1x4x32xf32, #tpu.memory_space<vmem>>, %arg2: memref<2x4x32xf32, #tpu.memory_space<vmem>>, %arg3: memref<1x4x32xf32, #tpu.memory_space<vmem>>) attributes {dimension_semantics = [#tpu.dimension_semantics<parallel>], iteration_bounds = array<i64: 1>, scalar_prefetch = 0 : i64, scratch_operands = 0 : i64, tpu.core_type = #tpu.core_type<tc>, window_params = [{transform_indices = @transform_0, window_bounds = array<i64: 2, 1, 4, 32>}, {transform_indices = @transform_1, window_bounds = array<i64: 2, 4, 32>}, {transform_indices = @transform_2, window_bounds = array<i64: 1, 4, 32>}]} {
    %c0 = arith.constant 0 : index
    %c0_0 = arith.constant 0 : index
    %c0_1 = arith.constant 0 : index
    %c0_2 = arith.constant 0 : index
    %0 = vector.load %arg1[%c0, %c0_0, %c0_1, %c0_2] : memref<2x1x4x32xf32, #tpu.memory_space<vmem>>, vector<2x1x4x32xf32>
    %1 = vector.shape_cast %0 : vector<2x1x4x32xf32> to vector<2x4x32xf32>
    %c0_3 = arith.constant 0 : index
    %c0_4 = arith.constant 0 : index
    %c0_5 = arith.constant 0 : index
    %2 = vector.load %arg2[%c0_3, %c0_4, %c0_5] : memref<2x4x32xf32, #tpu.memory_space<vmem>>, vector<2x4x32xf32>
    %cst = arith.constant dense<0xFF800000> : vector<2x4xf32>
    %3 = vector.multi_reduction <maximumf>, %1, %cst [2] : vector<2x4x32xf32> to vector<2x4xf32>
    %4 = vector.shape_cast %3 : vector<2x4xf32> to vector<2x4x1xf32>
    %5 = vector.broadcast %4 : vector<2x4x1xf32> to vector<2x4x32xf32>
    %6 = arith.subf %1, %5 : vector<2x4x32xf32>
    %7 = math.exp %6 : vector<2x4x32xf32>
    %cst_6 = arith.constant dense<0.000000e+00> : vector<2x4xf32>
    %8 = vector.multi_reduction <add>, %7, %cst_6 [2] : vector<2x4x32xf32> to vector<2x4xf32>
    %9 = vector.shape_cast %8 : vector<2x4xf32> to vector<2x4x1xf32>
    %10 = math.log %9 : vector<2x4x1xf32>
    %11 = vector.broadcast %10 : vector<2x4x1xf32> to vector<2x4x32xf32>
    %12 = arith.subf %6, %11 : vector<2x4x32xf32>
    %13 = arith.mulf %2, %2 : vector<2x4x32xf32>
    %cst_7 = arith.constant dense<0.000000e+00> : vector<2x4xf32>
    %14 = vector.multi_reduction <add>, %13, %cst_7 [2] : vector<2x4x32xf32> to vector<2x4xf32>
    %15 = vector.shape_cast %14 : vector<2x4xf32> to vector<2x4x1xf32>
    %16 = math.sqrt %15 : vector<2x4x1xf32>
    %cst_8 = arith.constant 9.99999996E-13 : f32
    %17 = vector.broadcast %cst_8 : f32 to vector<2x4x1xf32>
    %18 = arith.maximumf %16, %17 : vector<2x4x1xf32>
    %19 = tpu.reciprocal %18 : vector<2x4x1xf32> -> vector<2x4x1xf32>
    %20 = vector.broadcast %19 : vector<2x4x1xf32> to vector<2x4x32xf32>
    %21 = arith.mulf %2, %20 : vector<2x4x32xf32>
    %cst_9 = arith.constant 0.000000e+00 : f32
    %22 = vector.broadcast %cst_9 : f32 to vector<2x4x32xf32>
    %23 = arith.subf %22, %21 : vector<2x4x32xf32>
    %24 = arith.mulf %23, %12 : vector<2x4x32xf32>
    %cst_10 = arith.constant dense<0.000000e+00> : vector<4x32xf32>
    %25 = vector.multi_reduction <add>, %24, %cst_10 [0] : vector<2x4x32xf32> to vector<4x32xf32>
    %26 = vector.shape_cast %25 : vector<4x32xf32> to vector<1x4x32xf32>
    %c0_11 = arith.constant 0 : index
    %c0_12 = arith.constant 0 : index
    %c0_13 = arith.constant 0 : index
    %27 = vector.load %arg3[%c0_11, %c0_12, %c0_13] : memref<1x4x32xf32, #tpu.memory_space<vmem>>, vector<1x4x32xf32>
    tpu.vector_store %arg3[%c0_11, %c0_12, %c0_13], %26 {strides = array<i32>} : memref<1x4x32xf32, #tpu.memory_space<vmem>>, vector<1x4x32xf32>,
    return
  }
  func.func @transform_0(%arg0: i32) -> (i32, i32, i32, i32) {
    %c7_i32 = arith.constant 7 : i32
    %c0_i32 = arith.constant 0 : i32
    %c0_i32_0 = arith.constant 0 : i32
    %c0_i32_1 = arith.constant 0 : i32
    return %arg0, %c7_i32, %c0_i32, %c0_i32_0 : i32, i32, i32, i32
  }
  func.func @transform_1(%arg0: i32) -> (i32, i32, i32) {
    %c0_i32 = arith.constant 0 : i32
    %c0_i32_0 = arith.constant 0 : i32
    %c0_i32_1 = arith.constant 0 : i32
    return %arg0, %c0_i32, %c0_i32_0 : i32, i32, i32
  }
  func.func @transform_2(%arg0: i32) -> (i32, i32, i32) {
    %c0_i32 = arith.constant 0 : i32
    %c0_i32_0 = arith.constant 0 : i32
    %c0_i32_1 = arith.constant 0 : i32
    return %arg0, %c0_i32, %c0_i32_0 : i32, i32, i32
  }
}

</mosaic_0001>

<bundles_post_ra>
// kernel: tpu_custom_call.1
= control target key start
LH: loop header
LB: loop body
LE: loop exit
PB: predicated region body
PF: predicated region fallthrough
CT: control target
= control target key end

     0   :  { %7 = vsyncpa [#allocation3], 0  ;;  %s285_s0 = inlined_call_operand.hbm [shape: f32[2,8,4,32], index: 0, kind: input, shape index: {}]   ;;  %s286_s1 = inlined_call_operand.hbm [shape: f32[2,4,32], index: 1, kind: input, shape index: {}]   ;;  %s287_s2 = inlined_call_operand.hbm [shape: f32[1,4,32], index: 2, kind: output, shape index: {}]  }
   0x1   :  { %8 = vsyncpa [#allocation6], 0 }
   0x2   :  { %9 = vsyncpa [#allocation4], 0  ;;  %s15_s11 = scalar_lea.hbm %s285_s0, 448  ;;  %s219_s12 = smov [#allocation2]  }
   0x3   :  { %s16_s13 = sshll.u32 %s219_s12, 4  ;;  %s168_s16 = scalar_lea.hbm %s285_s0, 576  ;;  %s17_s13 = int_to_ptr.vmem [resolvable:$true] %s16_s13 }
   0x4   :  { %p145_p0 = scmp.ne.s32.totalorder %s15_s11, %s168_s16  ;;  %s146_s19 = scalar_lea.hbm %s285_s0, 1024 }
   0x5   :  { %p147_p1 = scmp.lt.u32.totalorder %s15_s11, %s285_s0  ;;  %p148_p2 = scmp.lt.u32.totalorder %s146_s19, %s168_s16 }
   0x6   :  { %p150_p4 = scmp.lt.u32.totalorder %s168_s16, %s15_s11 }
   0x7   :  { %p149_p3 = por %p148_p2, %p147_p1 }
   0x9   :  { %p151_p5 = por %p150_p4, %p149_p3 }
   0xb   :  { %p152_p6 = pnand %p151_p5, %p145_p0 }
   0xd   :  { %155 = shalt.err (!%p152_p6)
}
   0xe   :  { %s156_s22 = scalar_lea.vmem %s17_s13, 128  ;;  %p161_p8 = scmp.lt.s32.totalorder %s17_s13, %s17_s13 }
   0xf   :  { %p157_p7 = scmp.ne.s32.totalorder %s17_s13, %s156_s22  ;;  %p162_p9 = scmp.lt.s32.totalorder %s156_s22, %s156_s22 }
  0x11   :  { %p163_p10 = por %p162_p9, %p161_p8 }
  0x13   :  { %p164_p11 = pnand %p163_p10, %p157_p7 }
  0x15   :  { %167 = shalt.err (!%p164_p11)
}
  0x16   :  { %s220_s23 = smov 512   ;;  %s221_s24 = smov 64  }
  0x17   :  { %s222_s25 = smov 4   ;;  %s223_s26 = smov [#allocation5]  }
  0x18   :  { %22 = dma.hbm_to_vmem [thread:$0]  %s15_s11, 128, %s17_s13, [#allocation3], %s220_s23, %s221_s24, %s222_s25  }
  0x19   :  { %s28_s27 = sshll.u32 %s223_s26, 4  ;;  %s169_s29 = scalar_lea.hbm %s286_s1, 128  ;;  %s29_s27 = int_to_ptr.vmem [resolvable:$true] %s28_s27 }
  0x1a   :  { %p170_p12 = scmp.ne.s32.totalorder %s286_s1, %s169_s29  ;;  %p173_p13 = scmp.lt.u32.totalorder %s169_s29, %s286_s1 }
  0x1c   :  { %p175_p0 = pnand %p173_p13, %p170_p12 }
  0x1e   :  { %178 = shalt.err (!%p175_p0)
}
  0x1f   :  { %s179_s6 = scalar_lea.vmem %s29_s27, 128  ;;  %p184_p2 = scmp.lt.s32.totalorder %s29_s27, %s29_s27 }
  0x20   :  { %p180_p1 = scmp.ne.s32.totalorder %s29_s27, %s179_s6  ;;  %p185_p3 = scmp.lt.s32.totalorder %s179_s6, %s179_s6 }
  0x22   :  { %p186_p4 = por %p185_p3, %p184_p2 }
  0x24   :  { %p187_p5 = pnand %p186_p4, %p180_p1 }
  0x26   :  { %190 = shalt.err (!%p187_p5)
}
  0x27   :  { %34 = dma.hbm_to_vmem [thread:$0]  %s286_s1, 128, %s29_s27, [#allocation6], %s221_s24, %s221_s24, %s222_s25  }
  0x28   :  { %213 = dma.done.wait [#allocation3], 128  }
  0x29   :  { %214 = vsyncadd [#allocation3], 4294967168 }
  0x2a   :  { %215 = dma.done.wait [#allocation6], 128  }
  0x2b   :  { %216 = vsyncadd [#allocation6], 4294967168  ;;  %vm45_vm0 = vcmask 257024   ;;  %v41_v0 = vld [vmem:[#allocation2] sm:$0xf]  ;;  %s224_s1 = smov [#allocation7]  }
  0x2c   :  { %v42_v1 = vld [vmem:[#allocation2 + $0x4] sm:$0xf]  ;;  %v43_v2 = vld [vmem:[#allocation5] sm:$0xf]  ;;  %v46_v3 = vsel %vm45_vm0, %v41_v0, -inf  ;;  %s112_s9 = sshll.u32 %s224_s1, 4  ;;  %s113_s9 = int_to_ptr.vmem [resolvable:$true] %s112_s9 }
  0x2d   :  { %v70_v4 = vmul.f32 %v43_v2, %v43_v2  ;;  %v44_v5 = vld [vmem:[#allocation5 + $0x4] sm:$0xf]  ;;  %47 = vmax.xlane.f32.xlu0 %v46_v3  ;;  %v49_v7 = vsel %vm45_vm0, %v42_v1, -inf  ;;  %s191_s10 = scalar_lea.vmem %s113_s9, 64  ;;  %p196_p7 = scmp.lt.s32.totalorder %s113_s9, %s113_s9 }
  0x2e   :  { %v71_v6 = vmul.f32 %v44_v5, %v44_v5  ;;  %p192_p6 = scmp.ne.s32.totalorder %s113_s9, %s191_s10  ;;  %p197_p8 = scmp.lt.s32.totalorder %s191_s10, %s191_s10 }
  0x2f   :  { %v72_v8 = vsel %vm45_vm0, %v70_v4, 0.0 }
  0x30   :  { %73 = vadd.xlane.f32.xlu1 %v72_v8  ;;  %v75_v9 = vsel %vm45_vm0, %v71_v6, 0.0  ;;  %p198_p9 = por %p197_p8, %p196_p7 }
  0x31   :  { %50 = vmax.xlane.f32.xlu0 %v49_v7 }
  0x32   :  { %p199_p10 = pnand %p198_p9, %p192_p6 }
  0x34   :  { %76 = vadd.xlane.f32.xlu1 %v75_v9 }
  0xba   :  { %v48_v10 = vpop.xlane.xlu0 %47 }
  0xbb   :  { %v52_v11 = vsub.f32 %v41_v0, %v48_v10 }
  0xbd   :  { %v54_v12 = vmul.f32 1.442695, %v52_v11  ;;  %v74_v20 = vpop.xlane.xlu1 %73 }
  0xbe   :  { %v51_v13 = vpop.xlane.xlu0 %50  ;;  %vm80_vm1 = vcmp.eq.f32.partialorder %v74_v20, inf  ;;  %v83_v26 = vand.u32 2147483648, %v74_v20  ;;  %vm82_vm3 = vcmp.eq.f32.partialorder %v74_v20, 0.0 }
  0xbf   :  { %128 = vpow2.f32 %v54_v12  ;;  %v53_v14 = vsub.f32 %v42_v1, %v51_v13 }
  0xc1   :  { %v56_v15 = vmul.f32 1.442695, %v53_v14  ;;  %v77_v21 = vpop.xlane.xlu1 %76 }
  0xc2   :  { %vm87_vm2 = vcmp.eq.f32.partialorder %v77_v21, inf  ;;  %v90_v28 = vand.u32 2147483648, %v77_v21  ;;  %vm89_vm4 = vcmp.eq.f32.partialorder %v77_v21, 0.0 }
  0xc3   :  { %130 = vpow2.f32 %v56_v15 }
  0xc4   :  { %132 = vrsqrt.f32 %v74_v20 }
  0xc5   :  { %134 = vrsqrt.f32 %v77_v21 }
  0xc9   :  { %v129_v16 = vpop.eup %128 }
  0xca   :  { %v58_v17 = vsel %vm45_vm0, %v129_v16, 0.0 }
  0xcb   :  { %59 = vadd.xlane.f32.xlu0 %v58_v17 }
  0xcd   :  { %v131_v18 = vpop.eup %130 }
  0xce   :  { %v61_v19 = vsel %vm45_vm0, %v131_v18, 0.0  ;;  %v133_v22 = vpop.eup %132 }
  0xcf   :  { %62 = vadd.xlane.f32.xlu1 %v61_v19  ;;  %v135_v23 = vpop.eup %134  ;;  %v79_v24 = vmul.f32 %v133_v22, %v74_v20 }
  0xd0   :  { %v86_v25 = vmul.f32 %v135_v23, %v77_v21 }
  0xd1   :  { %v81_v27 = vsel %vm80_vm1, %v74_v20, %v79_v24 }
  0xd2   :  { %v88_v29 = vsel %vm87_vm2, %v77_v21, %v86_v25  ;;  %v84_v30 = vsel %vm82_vm3, %v83_v26, %v81_v27 }
  0xd3   :  { %v91_v31 = vsel %vm89_vm4, %v90_v28, %v88_v29  ;;  %v92_v32 = vmax.f32 %v84_v30, 1e-12 }
  0xd4   :  { %v93_v33 = vmax.f32 %v91_v31, 1e-12 }
  0xd5   :  { %136 = vrcp.f32 %v92_v32 }
  0xd6   :  { %138 = vrcp.f32 %v93_v33 }
  0xdf   :  { %v137_v36 = vpop.eup %136 }
  0xe0   :  { %v139_v37 = vpop.eup %138  ;;  %v96_v39 = vmul.f32 %v137_v36, %v43_v2 }
  0xe1   :  { %v97_v42 = vmul.f32 %v139_v37, %v44_v5 }
  0xe2   :  { %v98_v44 = vsub.f32 0.0, %v96_v39 }
  0xe3   :  { %v99_v47 = vsub.f32 0.0, %v97_v42 }
 0x158   :  { %v60_v34 = vpop.xlane.xlu0 %59 }
 0x159   :  { %140 = vlog2.f32 %v60_v34 }
 0x15c   :  { %v63_v35 = vpop.xlane.xlu1 %62 }
 0x15d   :  { %142 = vlog2.f32 %v63_v35 }
 0x163   :  { %v141_v38 = vpop.eup %140 }
 0x164   :  { %v65_v40 = vmul.f32 0.6931472, %v141_v38 }
 0x166   :  { %v68_v41 = vsub.f32 %v52_v11, %v65_v40 }
 0x167   :  { %v143_v43 = vpop.eup %142 }
 0x168   :  { %v67_v45 = vmul.f32 0.6931472, %v143_v43  ;;  %v100_v46 = vmul.f32 %v98_v44, %v68_v41 }
 0x16a   :  { %v69_v48 = vsub.f32 %v53_v14, %v67_v45  ;;  %v102_v50 = vsel %vm45_vm0, %v100_v46, 0.0 }
 0x16c   :  { %v101_v49 = vmul.f32 %v99_v47, %v69_v48 }
 0x16e   :  { %v103_v51 = vsel %vm45_vm0, %v101_v49, 0.0 }
 0x16f   :  { %v104_v52 = vadd.f32 %v103_v51, %v102_v50 }
 0x171   :  { %105 = vst.msk [vmem:[#allocation7] sm:$0xf] %vm45_vm0, %v104_v52 }
 0x172   :  { %202 = shalt.err (!%p199_p10)
}
 0x173   :  { %s203_s13 = scalar_lea.hbm %s287_s2, 64 }
 0x174   :  { %p204_p11 = scmp.ne.s32.totalorder %s287_s2, %s203_s13  ;;  %p207_p12 = scmp.lt.u32.totalorder %s203_s13, %s287_s2 }
 0x176   :  { %p209_p13 = pnand %p207_p12, %p204_p11 }
 0x178   :  { %212 = shalt.err (!%p209_p13)
}
 0x179   :  { %115 = dma.vmem_to_hbm [thread:$0]  %s113_s9, 64, %s287_s2, [#allocation4]  }
 0x17a   :  { %217 = dma.done.wait [#allocation4], 64  }
 0x17b   :  { %218 = vsyncadd [#allocation4], 4294967232 }
 0x17c   :  { %119 = vsyncpa [#allocation3], 1 }
 0x17d   :  { %120 = vsyncpa [#allocation6], 1 }
 0x17e   :  { %121 = vsyncpa [#allocation4], 1 }

</bundles_post_ra>
